<compile_context>
chip_gen: v7x
topology: tpu7x:2x2x1
jax: 0.10.0
libtpu: 0.0.40
codegen_flags: <defaults>
</compile_context>

<pallas_src>
import math
from functools import lru_cache

import numpy as np
import jax
import jax.numpy as jnp
from jax.experimental import pallas as pl
from jax.experimental.pallas import tpu as pltpu


# ----------------------------------------------------------------------------
# Hadamard construction (host-side, cached — never re-traced per call)
# ----------------------------------------------------------------------------
@lru_cache(maxsize=None)
def _sylvester_hadamard_np(n: int) -> np.ndarray:
    """Deterministic power-of-two Hadamard matrix (Sylvester construction)."""
    assert n > 0 and (n & (n - 1)) == 0, "size must be a power of 2"
    h = np.array([[1.0]], dtype=np.float32)
    while h.shape[0] < n:
        h = np.block([[h, h], [h, -h]])
    return h


# ----------------------------------------------------------------------------
# Pallas kernel: tiled biased matmul  y = x @ W_fused + b
# ----------------------------------------------------------------------------
def _fused_matmul_kernel(x_ref, w_ref, b_ref, o_ref, acc_ref):
    # x_ref : (tm, tk)   activation tile
    # w_ref : (tk, tn)   Hadamard-fused weight tile
    # b_ref : (1,  tn)   bias tile (f32)
    # o_ref : (tm, tn)   output tile
    # acc_ref: (tm, tn)  f32 accumulator scratch (resident across k)
    @pl.when(pl.program_id(2) == 0)
    def _init():
        acc_ref[...] = jnp.zeros_like(acc_ref)

    acc_ref[...] += jnp.dot(
        x_ref[...], w_ref[...], preferred_element_type=jnp.float32
    )

    @pl.when(pl.program_id(2) == pl.num_programs(2) - 1)
    def _finalize():
        o_ref[...] = (acc_ref[...] + b_ref[...]).astype(o_ref.dtype)


def _pick_tile(dim: int, target: int, quantum: int) -> int:
    """Largest tile <= target that divides `dim` and is a multiple of `quantum`;
    falls back to the full extent (always a legal BlockSpec block dim)."""
    if dim <= target:
        return dim
    t = (target // quantum) * quantum
    while t >= quantum:
        if dim % t == 0:
            return t
        t -= quantum
    return dim


# ----------------------------------------------------------------------------
# Wrapper
# ----------------------------------------------------------------------------
def input_fwd_hadamard_linear(x, weight, bias, *, tm=256, tn=256, tk=512):
    """x: (B, S, D); weight: (O, D); bias: (O,)  ->  (B, S, O)

    D (in_features) must be a power of 2 (matches the PyTorch wrapper assert).
    """
    B, S, D = x.shape
    O = weight.shape[0]
    assert weight.shape == (O, D)
    assert D > 0 and (D & (D - 1)) == 0, "in_features must be a power of 2"

    # --- Fold the scaled Hadamard into the weight (once, outside the kernel):
    #     (x @ H_s) @ W^T  ==  x @ (H_s @ W^T)
    h_scaled = jnp.asarray(_sylvester_hadamard_np(D) * (1.0 / math.sqrt(float(D))))
    w_fused = jnp.dot(
        h_scaled, weight.T.astype(jnp.float32), preferred_element_type=jnp.float32
    ).astype(x.dtype)                                    # (D, O)

    M = B * S
    x2 = x.reshape(M, D)
    b2 = bias.reshape(1, O).astype(jnp.float32)

    # Pad token dim to a multiple of 8 (sublane quantum) for legal tiling.
    M_pad = ((M + 7) // 8) * 8
    if M_pad != M:
        x2 = jnp.pad(x2, ((0, M_pad - M), (0, 0)))

    tm_ = _pick_tile(M_pad, tm, 8)     # sublane dim of x / out
    tk_ = _pick_tile(D, tk, 128)       # lane dim of x, sublane dim of w
    tn_ = _pick_tile(O, tn, 128)       # lane dim of w / out (lane-dense output)

    grid = (M_pad // tm_, O // tn_, D // tk_)

    itemsize = jnp.dtype(x.dtype).itemsize
    cost = pl.CostEstimate(
        flops=2 * M_pad * D * O,
        transcendentals=0,
        bytes_accessed=(M_pad * D * itemsize            # x
                        + D * O * itemsize              # fused weight
                        + O * 4                         # bias
                        + M_pad * O * itemsize),        # output
    )

    out = pl.pallas_call(
        _fused_matmul_kernel,
        out_shape=jax.ShapeDtypeStruct((M_pad, O), x.dtype),
        grid_spec=pltpu.PrefetchScalarGridSpec(
            num_scalar_prefetch=0,
            grid=grid,
            in_specs=[
                pl.BlockSpec((tm_, tk_), lambda m, n, k: (m, k)),   # x
                pl.BlockSpec((tk_, tn_), lambda m, n, k: (k, n)),   # W_fused
                pl.BlockSpec((1, tn_), lambda m, n, k: (0, n)),     # bias
            ],
            out_specs=pl.BlockSpec((tm_, tn_), lambda m, n, k: (m, n)),
            scratch_shapes=[pltpu.VMEM((tm_, tn_), jnp.float32)],
        ),
        compiler_params=pltpu.CompilerParams(
            dimension_semantics=("parallel", "parallel", "arbitrary"),
            vmem_limit_bytes=48 * 1024 * 1024,
        ),
        cost_estimate=cost,
    )(x2, w_fused, b2)

    return out[:M].reshape(B, S, O)


# ----------------------------------------------------------------------------
# Pure-JAX reference (matches the PyTorch module: transform, then Linear)
# ----------------------------------------------------------------------------
def reference(x, weight, bias):
    D = x.shape[-1]
    h = jnp.asarray(_sylvester_hadamard_np(D)) * (1.0 / math.sqrt(float(D)))
    xh = jnp.einsum("bsd,de->bse", x, h)
    return jnp.einsum("bse,oe->bso", xh, weight) + bias


if __name__ == "__main__":
    B, S, D, O = 2, 8, 32, 64   # D (in_features) must be a power of 2
    key = jax.random.PRNGKey(0)
    kx, kw, kb = jax.random.split(key, 3)

    x = jax.random.normal(kx, (B, S, D), dtype=jnp.float32)
    # Deterministic synthetic Linear parameters (torch.nn.Linear shapes).
    limit = 1.0 / math.sqrt(D)
    weight = jax.random.uniform(kw, (O, D), jnp.float32, -limit, limit)
    bias = jax.random.uniform(kb, (O,), jnp.float32, -limit, limit)

    y = input_fwd_hadamard_linear(x, weight, bias)
    y = jax.block_until_ready(y)

    y_ref = reference(x, weight, bias)
    assert y.shape == (B, S, O)
    assert jnp.allclose(y, y_ref, atol=1e-4, rtol=1e-4), "mismatch vs reference"

    print("KERNEL_OK")
</pallas_src>

<mosaic_0001>
module attributes {stable_mosaic.version = 11 : i64} {
  func.func @_fused_matmul_kernel(%arg0: i32, %arg1: i32, %arg2: i32, %arg3: memref<16x32xf32, #tpu.memory_space<vmem>>, %arg4: memref<32x64xf32, #tpu.memory_space<vmem>>, %arg5: memref<1x64xf32, #tpu.memory_space<vmem>>, %arg6: memref<16x64xf32, #tpu.memory_space<vmem>>, %arg7: memref<16x64xf32, #tpu.memory_space<vmem>>) attributes {dimension_semantics = [#tpu.dimension_semantics<parallel>, #tpu.dimension_semantics<parallel>, #tpu.dimension_semantics<arbitrary>], iteration_bounds = array<i64: 1, 1, 1>, scalar_prefetch = 0 : i64, scratch_operands = 1 : i64, tpu.core_type = #tpu.core_type<tc>, window_params = [{transform_indices = @transform_0, window_bounds = array<i64: 16, 32>}, {transform_indices = @transform_1, window_bounds = array<i64: 32, 64>}, {transform_indices = @transform_2, window_bounds = array<i64: 1, 64>}, {transform_indices = @transform_3, window_bounds = array<i64: 16, 64>}]} {
    %c0_i32 = arith.constant 0 : i32
    %0 = arith.cmpi eq, %arg2, %c0_i32 : i32
    %1 = arith.extui %0 : i1 to i32
    %c0_i32_0 = arith.constant 0 : i32
    %2 = arith.cmpi ne, %1, %c0_i32_0 : i32
    scf.if %2 {
      %cst_10 = arith.constant 0.000000e+00 : f32
      %12 = vector.broadcast %cst_10 : f32 to vector<16x64xf32>
      %c0_11 = arith.constant 0 : index
      %c0_12 = arith.constant 0 : index
      %13 = vector.load %arg7[%c0_11, %c0_12] : memref<16x64xf32, #tpu.memory_space<vmem>>, vector<16x64xf32>
      tpu.vector_store %arg7[%c0_11, %c0_12], %12 {strides = array<i32>} : memref<16x64xf32, #tpu.memory_space<vmem>>, vector<16x64xf32>,
    } else {
    }
    %c0 = arith.constant 0 : index
    %c0_1 = arith.constant 0 : index
    %3 = vector.load %arg7[%c0, %c0_1] : memref<16x64xf32, #tpu.memory_space<vmem>>, vector<16x64xf32>
    %c0_2 = arith.constant 0 : index
    %c0_3 = arith.constant 0 : index
    %4 = vector.load %arg3[%c0_2, %c0_3] : memref<16x32xf32, #tpu.memory_space<vmem>>, vector<16x32xf32>
    %c0_4 = arith.constant 0 : index
    %c0_5 = arith.constant 0 : index
    %5 = vector.load %arg4[%c0_4, %c0_5] : memref<32x64xf32, #tpu.memory_space<vmem>>, vector<32x64xf32>
    %cst = arith.constant dense<0.000000e+00> : vector<16x64xf32>
    %6 = tpu.matmul %4, %5, %cst {dimension_numbers = #tpu.dot_dimension_numbers<[1], [0], [0], [1], [0, 0, 1, 1], [], []>} : vector<16x32xf32>, vector<32x64xf32>, vector<16x64xf32> -> vector<16x64xf32>
    %7 = arith.addf %3, %6 : vector<16x64xf32>
    %c0_6 = arith.constant 0 : index
    %c0_7 = arith.constant 0 : index
    %8 = vector.load %arg7[%c0_6, %c0_7] : memref<16x64xf32, #tpu.memory_space<vmem>>, vector<16x64xf32>
    tpu.vector_store %arg7[%c0_6, %c0_7], %7 {strides = array<i32>} : memref<16x64xf32, #tpu.memory_space<vmem>>, vector<16x64xf32>,
    %c0_i32_8 = arith.constant 0 : i32
    %9 = arith.cmpi eq, %arg2, %c0_i32_8 : i32
    %10 = arith.extui %9 : i1 to i32
    %c0_i32_9 = arith.constant 0 : i32
    %11 = arith.cmpi ne, %10, %c0_i32_9 : i32
    scf.if %11 {
      %c0_10 = arith.constant 0 : index
      %c0_11 = arith.constant 0 : index
      %12 = vector.load %arg7[%c0_10, %c0_11] : memref<16x64xf32, #tpu.memory_space<vmem>>, vector<16x64xf32>
      %c0_12 = arith.constant 0 : index
      %c0_13 = arith.constant 0 : index
      %13 = vector.load %arg5[%c0_12, %c0_13] : memref<1x64xf32, #tpu.memory_space<vmem>>, vector<1x64xf32>
      %14 = vector.broadcast %13 : vector<1x64xf32> to vector<16x64xf32>
      %15 = arith.addf %12, %14 : vector<16x64xf32>
      %c0_14 = arith.constant 0 : index
      %c0_15 = arith.constant 0 : index
      %16 = vector.load %arg6[%c0_14, %c0_15] : memref<16x64xf32, #tpu.memory_space<vmem>>, vector<16x64xf32>
      tpu.vector_store %arg6[%c0_14, %c0_15], %15 {strides = array<i32>} : memref<16x64xf32, #tpu.memory_space<vmem>>, vector<16x64xf32>,
    } else {
    }
    return
  }
  func.func @transform_0(%arg0: i32, %arg1: i32, %arg2: i32) -> (i32, i32) {
    %c0_i32 = arith.constant 0 : i32
    return %arg0, %arg2 : i32, i32
  }
  func.func @transform_1(%arg0: i32, %arg1: i32, %arg2: i32) -> (i32, i32) {
    %c0_i32 = arith.constant 0 : i32
    return %arg2, %arg1 : i32, i32
  }
  func.func @transform_2(%arg0: i32, %arg1: i32, %arg2: i32) -> (i32, i32) {
    %c0_i32 = arith.constant 0 : i32
    %c0_i32_0 = arith.constant 0 : i32
    return %c0_i32, %arg1 : i32, i32
  }
  func.func @transform_3(%arg0: i32, %arg1: i32, %arg2: i32) -> (i32, i32) {
    %c0_i32 = arith.constant 0 : i32
    return %arg0, %arg1 : i32, i32
  }
}

</mosaic_0001>

<bundles_post_ra>
// kernel: tpu_custom_call.1
= control target key start
LH: loop header
LB: loop body
LE: loop exit
PB: predicated region body
PF: predicated region fallthrough
CT: control target
= control target key end

     0   :  { %8 = vsyncpa [#allocation4], 0  ;;  %s365_s0 = inlined_call_operand.hbm [shape: f32[16,32], index: 0, kind: input, shape index: {}]   ;;  %s366_s1 = inlined_call_operand.hbm [shape: f32[32,64], index: 1, kind: input, shape index: {}]   ;;  %s367_s2 = inlined_call_operand.vmem [shape: f32[1,64], index: 2, kind: input, shape index: {}]   ;;  %s368_s3 = inlined_call_operand.hbm [shape: f32[16,64], index: 3, kind: output, shape index: {}]  }
   0x1   :  { %9 = vsyncpa [#allocation7], 0 }
   0x2   :  { %10 = vsyncpa [#allocation5], 0  ;;  %s285_s12 = smov [#allocation3]   ;;  %s213_s16 = scalar_lea.hbm %s365_s0, 256 }
   0x3   :  { %s16_s13 = sshll.u32 %s285_s12, 4  ;;  %p214_p0 = scmp.ne.s32.totalorder %s365_s0, %s213_s16  ;;  %s17_s13 = int_to_ptr.vmem [resolvable:$true] %s16_s13 }
   0x4   :  { %p217_p1 = scmp.lt.u32.totalorder %s213_s16, %s365_s0 }
   0x6   :  { %p219_p2 = pnand %p217_p1, %p214_p0 }
   0x8   :  { %222 = shalt.err (!%p219_p2)
}
   0x9   :  { %s223_s21 = scalar_lea.vmem %s17_s13, 256  ;;  %p228_p4 = scmp.lt.s32.totalorder %s17_s13, %s17_s13 }
   0xa   :  { %p224_p3 = scmp.ne.s32.totalorder %s17_s13, %s223_s21  ;;  %p229_p5 = scmp.lt.s32.totalorder %s223_s21, %s223_s21 }
   0xc   :  { %p230_p6 = por %p229_p5, %p228_p4 }
   0xe   :  { %p231_p7 = pnand %p230_p6, %p224_p3 }
  0x10   :  { %234 = shalt.err (!%p231_p7)
}
  0x11   :  { %s286_s22 = smov 128   ;;  %s287_s23 = smov 8  }
  0x12   :  { %22 = dma.hbm_to_vmem [thread:$0]  %s365_s0, 256, %s17_s13, [#allocation4], %s286_s22, %s286_s22, %s287_s23  }
  0x13   :  { %s288_s26 = smov [#allocation6]   ;;  %s235_s30 = scalar_lea.hbm %s366_s1, 512 }
  0x14   :  { %s28_s27 = sshll.u32 %s288_s26, 4  ;;  %p236_p8 = scmp.ne.s32.totalorder %s366_s1, %s235_s30  ;;  %s29_s27 = int_to_ptr.vmem [resolvable:$true] %s28_s27 }
  0x15   :  { %p239_p9 = scmp.lt.u32.totalorder %s235_s30, %s366_s1 }
  0x17   :  { %p241_p10 = pnand %p239_p9, %p236_p8 }
  0x19   :  { %244 = shalt.err (!%p241_p10)
}
  0x1a   :  { %s245_s8 = scalar_lea.vmem %s29_s27, 512  ;;  %p250_p12 = scmp.lt.s32.totalorder %s29_s27, %s29_s27 }
  0x1b   :  { %p246_p11 = scmp.ne.s32.totalorder %s29_s27, %s245_s8  ;;  %p251_p13 = scmp.lt.s32.totalorder %s245_s8, %s245_s8 }
  0x1d   :  { %p252_p0 = por %p251_p13, %p250_p12 }
  0x1f   :  { %p253_p1 = pnand %p252_p0, %p246_p11 }
  0x21   :  { %256 = shalt.err (!%p253_p1)
}
  0x22   :  { %34 = dma.hbm_to_vmem [thread:$0]  %s366_s1, 512, %s29_s27, [#allocation7], %s286_s22, %s286_s22, %s287_s23  }
  0x23   :  { %279 = dma.done.wait [#allocation4], 256  }
  0x24   :  { %280 = vsyncadd [#allocation4], 4294967040 }
  0x25   :  { %281 = dma.done.wait [#allocation7], 512  }
  0x26   :  { %282 = vsyncadd [#allocation7], 4294966784  ;;  %vm47_vm0 = vcmask 523264   ;;  %v289_v0 = vmov 0.0   ;;  %vm58_vm1 = vcmask 261120   ;;  %v54_v1 = vld [vmem:[#allocation6] sm:$0xff] }
  0x27   :  { %49 = vst.msk [vmem:[#allocation2 + $0x8] sm:$0xff] %vm47_vm0, %v289_v0  ;;  %48 = vst.msk [vmem:[#allocation2] sm:$0xff] %vm47_vm0, %v289_v0  ;;  %v55_v2 = vld [vmem:[#allocation6 + $0x8] sm:$0xff]  ;;  %v56_v3 = vld [vmem:[#allocation6 + $0x10] sm:$0xff]  ;;  %s290_s11 = smov [#allocation8]  }
  0x28   :  { %v199_v4 = vpack.c.bf16 %v55_v2, %v54_v1  ;;  %v57_v5 = vld [vmem:[#allocation6 + $0x18] sm:$0xff]  ;;  %v52_v6 = vld [vmem:[#allocation3] sm:$0xff]  ;;  %v181_v15 = vld [vmem:[%s367_s2] ss:$0 sm:$0xff]  ;;  %s166_s12 = sshll.u32 %s290_s11, 4  ;;  %s167_s12 = int_to_ptr.vmem [resolvable:$true] %s166_s12 }
  0x29   :  { %v203_v7 = vpack.c.bf16 %v57_v5, %v56_v3  ;;  %196 = vmatprep.mubr.msk.f32.mxu0 %vm58_vm1, %v52_v6  ;;  %v53_v8 = vld [vmem:[#allocation3 + $0x8] sm:$0xff]  ;;  %s257_s13 = scalar_lea.vmem %s167_s12, 256  ;;  %p262_p3 = scmp.lt.s32.totalorder %s167_s12, %s167_s12 }
  0x2a   :  { %200 = vmatprep.subr.bf16.mxu0 %v199_v4  ;;  %p258_p2 = scmp.ne.s32.totalorder %s167_s12, %s257_s13  ;;  %p263_p4 = scmp.lt.s32.totalorder %s257_s13, %s257_s13 }
  0x2b   :  { %202 = vmatpush3.bf16.msra.mxu0 %v199_v4 }
  0x2c   :  { %204 = vmatprep.subr.bf16.mxu0 %v203_v7  ;;  %p264_p5 = por %p263_p4, %p262_p3 }
  0x2e   :  { %v51_v9 = vld [vmem:[#allocation2 + $0x8] sm:$0xff]  ;;  %v50_v10 = vld [vmem:[#allocation2] sm:$0xff]  ;;  %p265_p6 = pnand %p264_p5, %p258_p2 }
  0x2f   :  { %206 = vmatpush3.bf16.msra.mxu0 %v203_v7 }
  0x32   :  { %197 = vmatmul.mubr.msk.f32.vlgmr.msra.gmra.mrb[0].mxu0 %vm58_vm1, %v53_v8 }
 0x105   :  { %v198_v11 = vpop.f32.mrb[0].mxu0 }
 0x106   :  { %v141_v12 = vadd.f32 %v198_v11, %v51_v9  ;;  %v131_v13 = vpop.f32.mrb[1].mxu0 }
 0x107   :  { %v140_v14 = vadd.f32 %v131_v13, %v50_v10 }
 0x108   :  { %144 = vst.msk [vmem:[#allocation2 + $0x8] sm:$0xff] %vm47_vm0, %v141_v12 }
 0x109   :  { %143 = vst.msk [vmem:[#allocation2] sm:$0xff] %vm47_vm0, %v140_v14 }
 0x10f   :  { %v149_v16 = vld [vmem:[#allocation2 + $0x8] sm:$0xff] }
 0x110   :  { %v148_v17 = vld [vmem:[#allocation2] sm:$0xff]  ;;  %v158_v18 = vadd.f32 %v181_v15, %v149_v16 }
 0x111   :  { %v157_v19 = vadd.f32 %v181_v15, %v148_v17 }
 0x112   :  { %160 = vst.msk [vmem:[#allocation8 + $0x8] sm:$0xff] %vm47_vm0, %v158_v18 }
 0x113   :  { %159 = vst.msk [vmem:[#allocation8] sm:$0xff] %vm47_vm0, %v157_v19 }
 0x114   :  { %268 = shalt.err (!%p265_p6)
}
 0x115   :  { %s269_s15 = scalar_lea.hbm %s368_s3, 256 }
 0x116   :  { %p270_p7 = scmp.ne.s32.totalorder %s368_s3, %s269_s15  ;;  %p273_p8 = scmp.lt.u32.totalorder %s269_s15, %s368_s3 }
 0x118   :  { %p275_p9 = pnand %p273_p8, %p270_p7 }
 0x11a   :  { %278 = shalt.err (!%p275_p9)
}
 0x11b   :  { %172 = dma.vmem_to_hbm [thread:$0]  %s167_s12, 256, %s368_s3, [#allocation5], %s286_s22, %s286_s22, %s287_s23  }
 0x11c   :  { %283 = dma.done.wait [#allocation5], 256  }
 0x11d   :  { %284 = vsyncadd [#allocation5], 4294967040 }
 0x11e   :  { %176 = vsyncpa [#allocation4], 1 }
 0x11f   :  { %177 = vsyncpa [#allocation7], 1 }
 0x120   :  { %178 = vsyncpa [#allocation5], 1 }

</bundles_post_ra>
